<compile_context>
chip_gen: v7x
topology: tpu7x:2x2x1
jax: 0.10.0
libtpu: 0.0.40
codegen_flags: <defaults>
</compile_context>

<pallas_src>
import jax
import jax.numpy as jnp
from jax.experimental import pallas as pl
from jax.experimental.pallas import tpu as pltpu

_LANE = 128
_MAX_WIDTH = 2048                       # cap C so blocks are always full-width
_BLOCK_BUDGET_BYTES = 8 * 1024 * 1024   # ~8 MiB blocks (f32 working set)
_VMEM_LIMIT_BYTES = 48 * 1024 * 1024    # < 64 MiB physical VMEM on v7x
_RAGGED_TC = 128 * 1024                 # lane-dim block for the (1, n) ragged path


def _sigmoid_kernel(x_ref, o_ref):
    # Compute in f32 (safe on all chips; v5e EUP has no bf16 path) using the
    # single-transcendental form: one tanh EUP push + two VPU ops per element,
    # fully hidden under the DMA stream.
    # TODO(synk): bf16-native compute on v6e/v7x would drop two VPU casts per
    # vreg; needs chip-version gating (pltpu.get_tpu_info) to exclude v5e.
    x = x_ref[...].astype(jnp.float32)
    y = 0.5 * jnp.tanh(0.5 * x) + 0.5
    o_ref[...] = y.astype(o_ref.dtype)


def _run_2d(x2d, block_shape, grid, *, alias_input=False):
    """Launch the sigmoid kernel over a 2D slab with the given block/grid."""
    rows, cols = x2d.shape
    n = rows * cols
    itemsize = x2d.dtype.itemsize
    kwargs = {}
    if alias_input:
        # Elementwise map may write in place when the caller donates x.
        kwargs["input_output_aliases"] = {0: 0}
    return pl.pallas_call(
        _sigmoid_kernel,
        out_shape=jax.ShapeDtypeStruct((rows, cols), x2d.dtype),
        grid_spec=pltpu.PrefetchScalarGridSpec(
            num_scalar_prefetch=0,
            grid=grid,
            in_specs=[pl.BlockSpec(block_shape, lambda i, j: (i, j))],
            out_specs=pl.BlockSpec(block_shape, lambda i, j: (i, j)),
        ),
        compiler_params=pltpu.CompilerParams(
            # On v7x (2 TCs) this lets the grid shard across both cores; no-op
            # on v5e/v6e. TODO(synk): if an xprof trace shows one v7x TC idle,
            # switch the row axis to pltpu.CORE_PARALLEL.
            dimension_semantics=("parallel", "parallel"),
            vmem_limit_bytes=_VMEM_LIMIT_BYTES,
        ),
        cost_estimate=pl.CostEstimate(
            flops=3 * n, transcendentals=n, bytes_accessed=2 * n * itemsize
        ),
        **kwargs,
    )(x2d)


def sigmoid_pallas(x: jax.Array, *, donate: bool = False) -> jax.Array:
    """sigmoid(x) = 1 / (1 + exp(-x)) with the hot path in a Pallas TPU kernel.

    Works for arbitrary shape and floating dtype. `donate=True` aliases the
    output onto the (reshaped) input buffer when the caller donates x.
    """
    if not jnp.issubdtype(x.dtype, jnp.floating):
        raise TypeError(f"sigmoid_pallas supports floating dtypes only, got {x.dtype}")
    orig_shape = x.shape
    n = x.size
    if n == 0:
        return x

    # Size blocks against the in-kernel f32 working set, not just input bytes.
    eff_itemsize = max(x.dtype.itemsize, 4)

    # --- Aligned path: zero-copy reshape to a lane-dense (rows, C) slab. ---
    # Search all multiples of 128 (widest first) so tc == C always (contiguous
    # full-width DMA, effectively a 1-D grid).
    C = next((c for c in range(_MAX_WIDTH, 0, -_LANE) if n % c == 0), None)
    if C is not None:
        x2d = x.reshape(-1, C)              # free reshape, no extra HBM pass
        rows = x2d.shape[0]
        if rows <= 8:
            tr = rows                       # full-dim block is always legal
        else:
            tr = min(rows, max(8, (_BLOCK_BUDGET_BYTES // (C * eff_itemsize)) // 8 * 8))
        grid = (pl.cdiv(rows, tr), 1)
        out2d = _run_2d(x2d, (tr, C), grid, alias_input=donate)
        return out2d.reshape(orig_shape)

    # --- Ragged path (n not a multiple of 128): zero-copy reshape to (1, n)
    # and let Pallas mask the partial tail block. No pad / slice passes.
    x2d = x.reshape(1, n)
    tc = min(_RAGGED_TC, pl.cdiv(n, _LANE) * _LANE)
    grid = (1, pl.cdiv(n, tc))
    out2d = _run_2d(x2d, (1, tc), grid, alias_input=donate)
    return out2d.reshape(orig_shape)


if __name__ == "__main__":
    key = jax.random.PRNGKey(0)

    # Small NCHW-style input consistent with typical module usage.
    x = jax.random.normal(key, (2, 4, 16, 16), dtype=jnp.float32)
    y = jax.block_until_ready(sigmoid_pallas(x))
    y_ref = jax.nn.sigmoid(x)
    assert y.shape == x.shape and y.dtype == x.dtype
    assert bool(jnp.allclose(y, y_ref, rtol=1e-5, atol=1e-5)), "mismatch vs reference sigmoid"

    # Ragged size (exercises the zero-copy (1, n) masked-tail path).
    x2 = jax.random.normal(jax.random.PRNGKey(1), (3, 5, 7), dtype=jnp.float32)
    y2 = jax.block_until_ready(sigmoid_pallas(x2))
    assert bool(jnp.allclose(y2, jax.nn.sigmoid(x2), rtol=1e-5, atol=1e-5)), "ragged mismatch"

    # bf16 in/out (compute upcast to f32 inside the kernel).
    x3 = jax.random.normal(jax.random.PRNGKey(2), (8, 32), dtype=jnp.bfloat16)
    y3 = jax.block_until_ready(sigmoid_pallas(x3))
    assert y3.shape == x3.shape and y3.dtype == jnp.bfloat16
    assert bool(jnp.allclose(y3.astype(jnp.float32),
                             jax.nn.sigmoid(x3.astype(jnp.float32)),
                             rtol=2e-2, atol=2e-2)), "bf16 mismatch"

    # TODO(synk): `return_numpy=True` (torch -> numpy detach) is host-side glue
    # with no Pallas equivalent; callers can np.asarray(y) if needed.
    print("KERNEL_OK")
</pallas_src>

<mosaic_0001>
module attributes {stable_mosaic.version = 11 : i64} {
  func.func @_sigmoid_kernel(%arg0: i32, %arg1: i32, %arg2: memref<1x2048xf32, #tpu.memory_space<vmem>>, %arg3: memref<1x2048xf32, #tpu.memory_space<vmem>>) attributes {dimension_semantics = [#tpu.dimension_semantics<parallel>, #tpu.dimension_semantics<parallel>], iteration_bounds = array<i64: 1, 1>, scalar_prefetch = 0 : i64, scratch_operands = 0 : i64, tpu.core_type = #tpu.core_type<tc>, window_params = [{transform_indices = @transform_0, window_bounds = array<i64: 1, 2048>}, {transform_indices = @transform_1, window_bounds = array<i64: 1, 2048>}]} {
    %c0 = arith.constant 0 : index
    %c0_0 = arith.constant 0 : index
    %0 = vector.load %arg2[%c0, %c0_0] : memref<1x2048xf32, #tpu.memory_space<vmem>>, vector<1x2048xf32>
    %cst = arith.constant 5.000000e-01 : f32
    %1 = vector.broadcast %cst : f32 to vector<1x2048xf32>
    %2 = arith.mulf %1, %0 : vector<1x2048xf32>
    %3 = math.tanh %2 : vector<1x2048xf32>
    %cst_1 = arith.constant 5.000000e-01 : f32
    %4 = vector.broadcast %cst_1 : f32 to vector<1x2048xf32>
    %5 = arith.mulf %4, %3 : vector<1x2048xf32>
    %cst_2 = arith.constant 5.000000e-01 : f32
    %6 = vector.broadcast %cst_2 : f32 to vector<1x2048xf32>
    %7 = arith.addf %5, %6 : vector<1x2048xf32>
    %c0_3 = arith.constant 0 : index
    %c0_4 = arith.constant 0 : index
    %8 = vector.load %arg3[%c0_3, %c0_4] : memref<1x2048xf32, #tpu.memory_space<vmem>>, vector<1x2048xf32>
    tpu.vector_store %arg3[%c0_3, %c0_4], %7 {strides = array<i32>} : memref<1x2048xf32, #tpu.memory_space<vmem>>, vector<1x2048xf32>,
    return
  }
  func.func @transform_0(%arg0: i32, %arg1: i32) -> (i32, i32) {
    %c0_i32 = arith.constant 0 : i32
    return %arg0, %arg1 : i32, i32
  }
  func.func @transform_1(%arg0: i32, %arg1: i32) -> (i32, i32) {
    %c0_i32 = arith.constant 0 : i32
    return %arg0, %arg1 : i32, i32
  }
}

</mosaic_0001>

<bundles_post_ra>
// kernel: tpu_custom_call.1
= control target key start
LH: loop header
LB: loop body
LE: loop exit
PB: predicated region body
PF: predicated region fallthrough
CT: control target
= control target key end

     0   :  { %6 = vsyncpa [#allocation3], 0  ;;  %s138_s0 = inlined_call_operand.hbm [shape: f32[1,2048], index: 0, kind: input, shape index: {}]   ;;  %s139_s1 = inlined_call_operand.hbm [shape: f32[1,2048], index: 1, kind: output, shape index: {}]  }
   0x1   :  { %7 = vsyncpa [#allocation4], 0  ;;  %s102_s6 = smov [#allocation2]   ;;  %s54_s10 = scalar_lea.hbm %s138_s0, 256 }
   0x2   :  { %s14_s7 = sshll.u32 %s102_s6, 4  ;;  %p55_p0 = scmp.ne.s32.totalorder %s138_s0, %s54_s10  ;;  %s15_s7 = int_to_ptr.vmem [resolvable:$true] %s14_s7 }
   0x3   :  { %p58_p1 = scmp.lt.u32.totalorder %s54_s10, %s138_s0 }
   0x5   :  { %p60_p2 = pnand %p58_p1, %p55_p0 }
   0x7   :  { %63 = shalt.err (!%p60_p2)
}
   0x8   :  { %s64_s15 = scalar_lea.vmem %s15_s7, 256  ;;  %p69_p4 = scmp.lt.s32.totalorder %s15_s7, %s15_s7 }
   0x9   :  { %p65_p3 = scmp.ne.s32.totalorder %s15_s7, %s64_s15  ;;  %p70_p5 = scmp.lt.s32.totalorder %s64_s15, %s64_s15 }
   0xb   :  { %p71_p6 = por %p70_p5, %p69_p4 }
   0xd   :  { %p72_p7 = pnand %p71_p6, %p65_p3 }
   0xf   :  { %75 = shalt.err (!%p72_p7)
}
  0x10   :  { %17 = dma.hbm_to_vmem [thread:$0]  %s138_s0, 256, %s15_s7, [#allocation3]  }
  0x11   :  { %98 = dma.done.wait [#allocation3], 256  }
  0x12   :  { %99 = vsyncadd [#allocation3], 4294967040  ;;  %v21_v0 = vld [vmem:[#allocation2] sm:$0xff]  ;;  %v22_v1 = vld [vmem:[#allocation2 + $0x8] sm:$0xff]  ;;  %s103_s18 = smov [#allocation5]  }
  0x13   :  { %v23_v2 = vmul.f32 0.5, %v21_v0  ;;  %v24_v3 = vmul.f32 0.5, %v22_v1  ;;  %s39_s19 = sshll.u32 %s103_s18, 4  ;;  %s40_s19 = int_to_ptr.vmem [resolvable:$true] %s39_s19 }
  0x14   :  { %s76_s0 = scalar_lea.vmem %s40_s19, 256  ;;  %p81_p9 = scmp.lt.s32.totalorder %s40_s19, %s40_s19 }
  0x15   :  { %50 = vtanh.f32 %v23_v2  ;;  %p77_p8 = scmp.ne.s32.totalorder %s40_s19, %s76_s0  ;;  %p82_p10 = scmp.lt.s32.totalorder %s76_s0, %s76_s0 }
  0x16   :  { %52 = vtanh.f32 %v24_v3 }
  0x17   :  { %p83_p11 = por %p82_p10, %p81_p9 }
  0x19   :  { %p84_p12 = pnand %p83_p11, %p77_p8 }
  0x1f   :  { %v51_v4 = vpop.eup %50 }
  0x20   :  { %v53_v5 = vpop.eup %52  ;;  %v27_v6 = vmul.f32 0.5, %v51_v4 }
  0x21   :  { %v28_v7 = vmul.f32 0.5, %v53_v5 }
  0x22   :  { %v29_v8 = vadd.f32 0.5, %v27_v6 }
  0x23   :  { %v30_v9 = vadd.f32 0.5, %v28_v7 }
  0x24   :  { %31 = vst [vmem:[#allocation5] sm:$0xff] %v29_v8 }
  0x25   :  { %32 = vst [vmem:[#allocation5 + $0x8] sm:$0xff] %v30_v9 }
  0x26   :  { %87 = shalt.err (!%p84_p12)
}
  0x27   :  { %s88_s22 = scalar_lea.hbm %s139_s1, 256 }
  0x28   :  { %p89_p13 = scmp.ne.s32.totalorder %s139_s1, %s88_s22  ;;  %p92_p0 = scmp.lt.u32.totalorder %s88_s22, %s139_s1 }
  0x2a   :  { %p94_p1 = pnand %p92_p0, %p89_p13 }
  0x2c   :  { %97 = shalt.err (!%p94_p1)
}
  0x2d   :  { %42 = dma.vmem_to_hbm [thread:$0]  %s40_s19, 256, %s139_s1, [#allocation4]  }
  0x2e   :  { %100 = dma.done.wait [#allocation4], 256  }
  0x2f   :  { %101 = vsyncadd [#allocation4], 4294967040 }
  0x30   :  { %46 = vsyncpa [#allocation3], 1 }
  0x31   :  { %47 = vsyncpa [#allocation4], 1 }

</bundles_post_ra>
